<compile_context>
chip_gen: v6e
topology: v6e:2x2x1
jax: 0.10.0
libtpu: 0.0.40
codegen_flags: <defaults>
</compile_context>

<pallas_src>
import functools

import jax
import jax.numpy as jnp
from jax.experimental import pallas as pl
from jax.experimental.pallas import tpu as pltpu


def _focal_loss_kernel(x_ref, t_ref, a_ref, o_ref, *, gamma, n_valid, tile_n,
                       bf16_exp):
    # x_ref: (TILE_N, C) logits (native dtype)
    # t_ref: (TILE_N, 1) int32 class ids
    # a_ref: (TILE_N, 1) float32 pre-gathered alpha[target]
    # o_ref: (1, 8, 128) float32 per-tile partial sum (splatted)
    x = x_ref[...].astype(jnp.float32)
    t = t_ref[...]
    alpha_t = a_ref[...]

    tn, c = x.shape

    # One-hot compare (the scatter_ in PyTorch) used to gather x[target].
    col = jax.lax.broadcasted_iota(jnp.int32, (tn, c), 1)
    class_mask = col == t                                          # (T, C)

    # Gathered log-softmax (numerically stable; no materialized softmax).
    m = jnp.max(x, axis=1, keepdims=True)                          # (T, 1)
    if bf16_exp:
        # v6e/v7x only: bulk exp in bf16 on the EUP, accumulate in f32.
        e = jnp.exp((x - m).astype(jnp.bfloat16))
        s = jnp.sum(e, axis=1, keepdims=True, dtype=jnp.float32)   # (T, 1)
    else:
        s = jnp.sum(jnp.exp(x - m), axis=1, keepdims=True)         # (T, 1)
    x_t = jnp.sum(jnp.where(class_mask, x, 0.0), axis=1, keepdims=True)

    log_p_t = (x_t - m) - jnp.log(s)                               # (T, 1)
    p_t = jnp.exp(log_p_t)
    # Clamp: fp noise / out-of-range targets must not produce NaN via pow.
    one_minus = jnp.maximum(1.0 - p_t, 0.0)

    g = float(gamma)
    if g == int(g) and int(g) >= 0:
        gi = int(g)
        if gi == 0:
            w = jnp.ones_like(one_minus)
        else:
            w = one_minus                         # gamma=2 -> one multiply
            for _ in range(gi - 1):
                w = w * one_minus
    else:
        w = jnp.power(one_minus, g)

    per_row = -alpha_t * w * log_p_t                               # (T, 1)

    # Discard garbage rows of the ragged last block (select, not multiply,
    # so NaN/Inf from OOB-read logits cannot propagate).
    row = jax.lax.broadcasted_iota(jnp.int32, (tn, 1), 0) + pl.program_id(0) * tile_n
    per_row = jnp.where(row < n_valid, per_row, 0.0)

    partial = jnp.sum(per_row, axis=0, keepdims=True)              # (1, 1)
    o_ref[...] = jnp.broadcast_to(partial.reshape(1, 1, 1), o_ref.shape)


def _chip_budget():
    """Per-generation (vmem_limit_bytes, is_v5_family)."""
    kind = ""
    try:
        kind = jax.devices()[0].device_kind.lower()
    except Exception:
        pass
    is_v5 = "v5" in kind
    if is_v5 or "v6" in kind:
        # 128 MiB physical VMEM: large blocks amortize ~0.35us/step overhead.
        return 64 * 1024 * 1024, is_v5
    # v7x (64 MiB per-TC VMEM) or unknown: conservative budget.
    return 36 * 1024 * 1024, is_v5


_F32_TEMPS = 5  # live (T, C) f32 intermediates: cast, x-m, exp, iota, selects


def _choose_tile_n(n, c, itemsize, vmem_limit_bytes):
    # Budget = double-buffered native input block + ~5x f32 (T,C) temps,
    # kept under ~75% of the scoped VMEM limit.
    budget = int(vmem_limit_bytes * 0.75)
    per_row = c * (2 * itemsize + 4 * _F32_TEMPS) + 64
    t = max(8, budget // per_row)
    if t >= 128:
        t = (t // 128) * 128            # lane/sublane-friendly large tiles
    else:
        t = max(8, (t // 8) * 8)
    n_ceil8 = ((n + 7) // 8) * 8
    t = min(t, n_ceil8)
    t = max(8, (t // 8) * 8)
    # v7x has 2 TensorCores: never collapse a non-trivial batch into one tile.
    if n >= 256 and t >= n:
        half = (n + 1) // 2
        t2 = ((half + 127) // 128) * 128
        if t2 >= n:
            t2 = ((half + 7) // 8) * 8
        t = max(8, min(t, t2))
    return t


def focal_loss(inputs, targets, alpha, gamma=2.0, size_average=True, tile_n=None):
    """inputs: (N, C) float logits; targets: (N,) int ids; alpha: (C,) or (C,1)."""
    n, c = inputs.shape
    itemsize = jnp.dtype(inputs.dtype).itemsize

    vmem_limit, is_v5 = _chip_budget()
    if tile_n is None:
        tile_n = _choose_tile_n(n, c, itemsize, vmem_limit)
    num_tiles = pl.cdiv(n, tile_n)

    # Tiny (N,1) side inputs; logits are passed unpadded in their native dtype.
    t2d = targets.astype(jnp.int32).reshape(n, 1)
    a_t = alpha.astype(jnp.float32).reshape(-1)[targets].reshape(n, 1)

    # bf16 EUP exp only where the hardware supports it (not v5e).
    bf16_exp = (inputs.dtype == jnp.bfloat16) and (not is_v5)

    kernel = functools.partial(
        _focal_loss_kernel, gamma=float(gamma), n_valid=n, tile_n=tile_n,
        bf16_exp=bf16_exp)

    partials = pl.pallas_call(
        kernel,
        out_shape=jax.ShapeDtypeStruct((num_tiles, 8, 128), jnp.float32),
        grid=(num_tiles,),
        in_specs=[
            pl.BlockSpec((tile_n, c), lambda i: (i, 0)),
            pl.BlockSpec((tile_n, 1), lambda i: (i, 0)),
            pl.BlockSpec((tile_n, 1), lambda i: (i, 0)),
        ],
        out_specs=pl.BlockSpec((1, 8, 128), lambda i: (i, 0, 0)),
        compiler_params=pltpu.CompilerParams(
            dimension_semantics=("parallel",),
            vmem_limit_bytes=vmem_limit,
        ),
    )(inputs, t2d, a_t)

    total = jnp.sum(partials[:, 0, 0])
    if size_average:
        return total / jnp.float32(n)   # mean over the *global* batch
    return total


def focal_loss_ref(inputs, targets, alpha, gamma=2.0, size_average=True):
    # Plain-JAX reference mirroring the PyTorch forward.
    p = jax.nn.softmax(inputs.astype(jnp.float32), axis=1)
    n, c = inputs.shape
    mask = jax.nn.one_hot(targets, c, dtype=jnp.float32)
    probs = jnp.sum(p * mask, axis=1, keepdims=True)
    a = alpha.astype(jnp.float32).reshape(-1)[targets].reshape(-1, 1)
    bl = -a * jnp.power(1.0 - probs, gamma) * jnp.log(probs)
    return jnp.mean(bl) if size_average else jnp.sum(bl)


if __name__ == "__main__":
    key = jax.random.PRNGKey(0)
    k_x, k_t, k_x2, k_t2 = jax.random.split(key, 4)

    # Case 1: module defaults (alpha=None -> ones, gamma=2, mean reduction).
    N, C = 8, 4
    inputs = jax.random.normal(k_x, (N, C), dtype=jnp.float32)
    targets = jax.random.randint(k_t, (N,), 0, C, dtype=jnp.int32)
    alpha = jnp.ones((C,), dtype=jnp.float32)

    loss = jax.block_until_ready(
        focal_loss(inputs, targets, alpha, gamma=2.0, size_average=True))
    ref = focal_loss_ref(inputs, targets, alpha, gamma=2.0, size_average=True)
    assert jnp.allclose(loss, ref, rtol=1e-5, atol=1e-6), (loss, ref)

    # Case 2: ragged batch + per-class alpha, sum reduction (single tile).
    N2, C2 = 13, 5
    inputs2 = jax.random.normal(k_x2, (N2, C2), dtype=jnp.float32)
    targets2 = jax.random.randint(k_t2, (N2,), 0, C2, dtype=jnp.int32)
    alpha2 = jnp.linspace(0.25, 1.0, C2, dtype=jnp.float32)

    loss2 = jax.block_until_ready(
        focal_loss(inputs2, targets2, alpha2, gamma=2.0, size_average=False))
    ref2 = focal_loss_ref(inputs2, targets2, alpha2, gamma=2.0, size_average=False)
    assert jnp.allclose(loss2, ref2, rtol=1e-5, atol=1e-5), (loss2, ref2)

    # Case 3: forced tile_n=8 -> 2 grid steps with a ragged, unpadded last tile
    # (exercises OOB-row masking and the per-tile partial-sum output path).
    loss3 = jax.block_until_ready(
        focal_loss(inputs2, targets2, alpha2, gamma=2.0, size_average=True, tile_n=8))
    ref3 = focal_loss_ref(inputs2, targets2, alpha2, gamma=2.0, size_average=True)
    assert jnp.allclose(loss3, ref3, rtol=1e-5, atol=1e-6), (loss3, ref3)

    print("KERNEL_OK")
</pallas_src>

<mosaic_0001>
module attributes {stable_mosaic.version = 11 : i64} {
  func.func @_focal_loss_kernel(%arg0: i32, %arg1: memref<8x4xf32, #tpu.memory_space<vmem>>, %arg2: memref<8x1xi32, #tpu.memory_space<vmem>>, %arg3: memref<8x1xf32, #tpu.memory_space<vmem>>, %arg4: memref<1x8x128xf32, #tpu.memory_space<vmem>>) attributes {dimension_semantics = [#tpu.dimension_semantics<parallel>], iteration_bounds = array<i64: 1>, scalar_prefetch = 0 : i64, scratch_operands = 0 : i64, tpu.core_type = #tpu.core_type<tc>, window_params = [{transform_indices = @transform_0, window_bounds = array<i64: 8, 4>}, {transform_indices = @transform_1, window_bounds = array<i64: 8, 1>}, {transform_indices = @transform_2, window_bounds = array<i64: 8, 1>}, {transform_indices = @transform_3, window_bounds = array<i64: 1, 8, 128>}]} {
    %c0 = arith.constant 0 : index
    %c0_0 = arith.constant 0 : index
    %0 = vector.load %arg1[%c0, %c0_0] : memref<8x4xf32, #tpu.memory_space<vmem>>, vector<8x4xf32>
    %c0_1 = arith.constant 0 : index
    %c0_2 = arith.constant 0 : index
    %1 = vector.load %arg2[%c0_1, %c0_2] : memref<8x1xi32, #tpu.memory_space<vmem>>, vector<8x1xi32>
    %c0_3 = arith.constant 0 : index
    %c0_4 = arith.constant 0 : index
    %2 = vector.load %arg3[%c0_3, %c0_4] : memref<8x1xf32, #tpu.memory_space<vmem>>, vector<8x1xf32>
    %3 = tpu.iota {dimensions = array<i32: 1>} : vector<8x4xi32>
    %4 = vector.broadcast %1 : vector<8x1xi32> to vector<8x4xi32>
    %5 = arith.cmpi eq, %3, %4 : vector<8x4xi32>
    %cst = arith.constant dense<0xFF800000> : vector<8xf32>
    %6 = vector.multi_reduction <maximumf>, %0, %cst [1] : vector<8x4xf32> to vector<8xf32>
    %7 = vector.shape_cast %6 : vector<8xf32> to vector<8x1xf32>
    %8 = vector.broadcast %7 : vector<8x1xf32> to vector<8x4xf32>
    %9 = arith.subf %0, %8 : vector<8x4xf32>
    %10 = math.exp %9 : vector<8x4xf32>
    %cst_5 = arith.constant dense<0.000000e+00> : vector<8xf32>
    %11 = vector.multi_reduction <add>, %10, %cst_5 [1] : vector<8x4xf32> to vector<8xf32>
    %12 = vector.shape_cast %11 : vector<8xf32> to vector<8x1xf32>
    %cst_6 = arith.constant 0.000000e+00 : f32
    %13 = vector.broadcast %cst_6 : f32 to vector<8x4xf32>
    %14 = arith.select %5, %0, %13 : vector<8x4xi1>, vector<8x4xf32>
    %cst_7 = arith.constant dense<0.000000e+00> : vector<8xf32>
    %15 = vector.multi_reduction <add>, %14, %cst_7 [1] : vector<8x4xf32> to vector<8xf32>
    %16 = vector.shape_cast %15 : vector<8xf32> to vector<8x1xf32>
    %17 = arith.subf %16, %7 : vector<8x1xf32>
    %18 = math.log %12 : vector<8x1xf32>
    %19 = arith.subf %17, %18 : vector<8x1xf32>
    %20 = math.exp %19 : vector<8x1xf32>
    %cst_8 = arith.constant 1.000000e+00 : f32
    %21 = vector.broadcast %cst_8 : f32 to vector<8x1xf32>
    %22 = arith.subf %21, %20 : vector<8x1xf32>
    %cst_9 = arith.constant 0.000000e+00 : f32
    %23 = vector.broadcast %cst_9 : f32 to vector<8x1xf32>
    %24 = arith.maximumf %22, %23 : vector<8x1xf32>
    %25 = arith.mulf %24, %24 : vector<8x1xf32>
    %cst_10 = arith.constant 0.000000e+00 : f32
    %26 = vector.broadcast %cst_10 : f32 to vector<8x1xf32>
    %27 = arith.subf %26, %2 : vector<8x1xf32>
    %28 = arith.mulf %27, %25 : vector<8x1xf32>
    %29 = arith.mulf %28, %19 : vector<8x1xf32>
    %30 = tpu.iota {dimensions = array<i32: 0>} : vector<8x1xi32>
    %c8_i32 = arith.constant 8 : i32
    %31 = arith.muli %arg0, %c8_i32 : i32
    %32 = vector.broadcast %31 : i32 to vector<8x1xi32>
    %33 = arith.addi %30, %32 : vector<8x1xi32>
    %c8_i32_11 = arith.constant 8 : i32
    %34 = vector.broadcast %c8_i32_11 : i32 to vector<8x1xi32>
    %35 = arith.cmpi slt, %33, %34 : vector<8x1xi32>
    %cst_12 = arith.constant 0.000000e+00 : f32
    %36 = vector.broadcast %cst_12 : f32 to vector<8x1xf32>
    %37 = arith.select %35, %29, %36 : vector<8x1xi1>, vector<8x1xf32>
    %cst_13 = arith.constant dense<0.000000e+00> : vector<1xf32>
    %38 = vector.multi_reduction <add>, %37, %cst_13 [0] : vector<8x1xf32> to vector<1xf32>
    %39 = vector.shape_cast %38 : vector<1xf32> to vector<1x1xf32>
    %40 = vector.shape_cast %39 : vector<1x1xf32> to vector<1x1x1xf32>
    %41 = vector.shape_cast %40 : vector<1x1x1xf32> to vector<1x1x1xf32>
    %42 = vector.broadcast %41 : vector<1x1x1xf32> to vector<1x8x128xf32>
    %c0_14 = arith.constant 0 : index
    %c0_15 = arith.constant 0 : index
    %c0_16 = arith.constant 0 : index
    %43 = vector.load %arg4[%c0_14, %c0_15, %c0_16] : memref<1x8x128xf32, #tpu.memory_space<vmem>>, vector<1x8x128xf32>
    tpu.vector_store %arg4[%c0_14, %c0_15, %c0_16], %42 {strides = array<i32>} : memref<1x8x128xf32, #tpu.memory_space<vmem>>, vector<1x8x128xf32>,
    return
  }
  func.func @transform_0(%arg0: i32) -> (i32, i32) {
    %c0_i32 = arith.constant 0 : i32
    %c0_i32_0 = arith.constant 0 : i32
    return %arg0, %c0_i32 : i32, i32
  }
  func.func @transform_1(%arg0: i32) -> (i32, i32) {
    %c0_i32 = arith.constant 0 : i32
    %c0_i32_0 = arith.constant 0 : i32
    return %arg0, %c0_i32 : i32, i32
  }
  func.func @transform_2(%arg0: i32) -> (i32, i32) {
    %c0_i32 = arith.constant 0 : i32
    %c0_i32_0 = arith.constant 0 : i32
    return %arg0, %c0_i32 : i32, i32
  }
  func.func @transform_3(%arg0: i32) -> (i32, i32, i32) {
    %c0_i32 = arith.constant 0 : i32
    %c0_i32_0 = arith.constant 0 : i32
    %c0_i32_1 = arith.constant 0 : i32
    return %arg0, %c0_i32, %c0_i32_0 : i32, i32, i32
  }
}

</mosaic_0001>

<bundles_post_ra>
// kernel: tpu_custom_call.1
= control target key start
LH: loop header
LB: loop body
LE: loop exit
PB: predicated region body
PF: predicated region fallthrough
CT: control target
= control target key end

     0   :  { %vm24_vm0 = vcmask 31744   ;;  %s154_s0 = inlined_call_operand.vmem [shape: f32[8,4], index: 0, kind: input, shape index: {}]   ;;  %s155_s1 = inlined_call_operand.vmem [shape: s32[8,1], index: 1, kind: input, shape index: {}]   ;;  %s156_s2 = inlined_call_operand.vmem [shape: f32[8,1], index: 2, kind: input, shape index: {}]   ;;  %s157_s3 = inlined_call_operand.hbm [shape: f32[1,8,128], index: 3, kind: output, shape index: {}]  }
   0x1   :  { %v15_v0 = vld [vmem:[%s154_s0] sm:$0xff] }
   0x2   :  { %8 = vsyncpa [#allocation3], 0  ;;  %v25_v1 = vsel %vm24_vm0, %v15_v0, -inf  ;;  %v117_v2 = vmov 0   ;;  %v16_v3 = vld [vmem:[%s155_s1] sm:$0xff]  ;;  %v18_v7 = vlaneseq  ;;  %vm57_vm2 = vcmask 7168  }
   0x3   :  { %87 = vset.pattern.permute.xlu0 %v117_v2  ;;  %88 = vset.pattern.permute.xlu1 %v117_v2  ;;  %v17_v22 = vld [vmem:[%s156_s2] sm:$0xff]  ;;  %s118_s16 = smov [#allocation2]  }
   0x4   :  { %26 = vmax.xlane.f32.xlu0 %v25_v1  ;;  %v19_v8 = vand.u32 127, %v18_v7  ;;  %v47_v24 = vsub.f32 0.0, %v17_v22  ;;  %s77_s17 = sshll.u32 %s118_s16, 4  ;;  %s78_s17 = int_to_ptr.vmem [resolvable:$true] %s77_s17 }
   0x5   :  { %s95_s2 = scalar_lea.vmem %s78_s17, 128  ;;  %p100_p1 = scmp.lt.s32.totalorder %s78_s17, %s78_s17 }
   0x6   :  { %p96_p0 = scmp.ne.s32.totalorder %s78_s17, %s95_s2  ;;  %p101_p2 = scmp.lt.s32.totalorder %s95_s2, %s95_s2 }
   0x8   :  { %p102_p3 = por %p101_p2, %p100_p1 }
   0xa   :  { %p103_p4 = pnand %p102_p3, %p96_p0 }
  0x1a   :  { %21 = vperm.xlu0 %87, %v16_v3  }
  0x8d   :  { %v27_v4 = vpop.xlane.xlu0 %26 }
  0x8e   :  { %v28_v5 = vsub.f32 %v15_v0, %v27_v4 }
  0x90   :  { %v29_v6 = vmul.f32 1.442695, %v28_v5 }
  0x92   :  { %89 = vpow2.f32 %v29_v6 }
  0x95   :  { %v22_v9 = vpop.permute.xlu0 %21 }
  0x96   :  { %vm23_vm1 = vcmp.eq.s32.totalorder %v19_v8, %v22_v9 }
  0x97   :  { %v34_v11 = vsel %vm23_vm1, %v15_v0, 0.0 }
  0x98   :  { %v35_v13 = vsel %vm24_vm0, %v34_v11, 0.0 }
  0x9f   :  { %v90_v10 = vpop.eup %89 }
  0xa0   :  { %v31_v12 = vsel %vm24_vm0, %v90_v10, 0.0 }
  0xa1   :  { %32 = vadd.xlane.f32.xlu1 %v31_v12 }
  0xa5   :  { %36 = vadd.xlane.f32.xlu1 %v35_v13 }
 0x12a   :  { %v33_v14 = vpop.xlane.xlu1 %32 }
 0x12b   :  { %91 = vlog2.f32 %v33_v14 }
 0x12e   :  { %v37_v15 = vpop.xlane.xlu1 %36 }
 0x12f   :  { %v38_v18 = vsub.f32 %v37_v15, %v27_v4 }
 0x138   :  { %v92_v16 = vpop.eup %91 }
 0x139   :  { %v40_v17 = vmul.f32 0.6931472, %v92_v16 }
 0x13b   :  { %v41_v19 = vsub.f32 %v38_v18, %v40_v17 }
 0x13d   :  { %v42_v20 = vmul.f32 1.442695, %v41_v19 }
 0x13f   :  { %93 = vpow2.f32 %v42_v20 }
 0x14c   :  { %v94_v21 = vpop.eup %93 }
 0x14d   :  { %v44_v23 = vsub.f32 1.0, %v94_v21 }
 0x14f   :  { %v45_v25 = vmax.f32 %v44_v23, 0.0 }
 0x151   :  { %v46_v26 = vmul.f32 %v45_v25, %v45_v25 }
 0x153   :  { %v48_v27 = vmul.f32 %v47_v24, %v46_v26 }
 0x155   :  { %v49_v28 = vmul.f32 %v48_v27, %v41_v19 }
 0x157   :  { %v58_v29 = vsel %vm57_vm2, %v49_v28, 0.0 }
 0x158   :  { %v59_v30 = vrot.slane %v58_v29, 4 }
 0x15a   :  { %v60_v31 = vadd.f32 %v59_v30, %v58_v29 }
 0x15c   :  { %v61_v32 = vrot.slane %v60_v31, 2 }
 0x15e   :  { %v62_v33 = vadd.f32 %v61_v32, %v60_v31 }
 0x160   :  { %v63_v34 = vrot.slane %v62_v33, 1 }
 0x162   :  { %v64_v35 = vadd.f32 %v63_v34, %v62_v33 }
 0x164   :  { %67 = vperm.xlu1 %88, %v64_v35  }
 0x1df   :  { %v68_v36 = vpop.permute.xlu1 %67 }
 0x1e0   :  { %70 = vst [vmem:[#allocation2] sm:$0xff] %v68_v36 }
 0x1e1   :  { %106 = shalt.err (!%p103_p4)
}
 0x1e2   :  { %80 = dma.vmem_to_hbm [thread:$0]  %s78_s17, 128, %s157_s3, [#allocation3]  }
 0x1e3   :  { %115 = dma.done.wait [#allocation3], 128  }
 0x1e4   :  { %116 = vsyncadd [#allocation3], 4294967168 }
 0x1e5   :  { %84 = vsyncpa [#allocation3], 1 }

</bundles_post_ra>
